<compile_context>
chip_gen: v7x
topology: tpu7x:2x2x1
jax: 0.10.0
libtpu: 0.0.40
codegen_flags: <defaults>
</compile_context>

<pallas_src>
import jax
import jax.numpy as jnp
from jax.experimental import pallas as pl
from jax.experimental.pallas import tpu as pltpu


def _round_up(x, m):
    return ((x + m - 1) // m) * m


def decoder_kernel(z_ref, w1_ref, b1_ref, w2_ref, b2_ref, out_ref):
    # fc1: bf16 operands on the MXU, f32 accumulate; bias + ReLU in f32.
    h = jnp.dot(z_ref[...], w1_ref[...], preferred_element_type=jnp.float32)
    h = jnp.maximum(h + b1_ref[...], 0.0)
    # fc2: cast activation to bf16 for the MXU, accumulate f32.
    y = jnp.dot(h.astype(w2_ref.dtype), w2_ref[...],
                preferred_element_type=jnp.float32)
    y = y + b2_ref[...]
    out_ref[...] = jax.nn.sigmoid(y).astype(out_ref.dtype)


def prepare_decoder_params(w1, b1, w2, b2):
    """One-time prep (call at init, NOT per forward): pad the hidden axis to
    128 lanes, cast weights to bf16, keep biases f32. Padded hidden columns
    are zero (relu(0)=0) and the matching w2 rows are zero, so semantics are
    exact."""
    latent, hidden = w1.shape
    output = w2.shape[1]
    HP = _round_up(hidden, 128)
    w1_p = jnp.zeros((latent, HP), jnp.bfloat16).at[:, :hidden].set(
        w1.astype(jnp.bfloat16))
    b1_p = jnp.zeros((1, HP), jnp.float32).at[:, :hidden].set(
        b1.reshape(1, -1).astype(jnp.float32))
    w2_p = jnp.zeros((HP, output), jnp.bfloat16).at[:hidden, :].set(
        w2.astype(jnp.bfloat16))
    b2_p = b2.reshape(1, -1).astype(jnp.float32)
    return dict(w1=w1_p, b1=b1_p, w2=w2_p, b2=b2_p,
                latent=latent, hidden=hidden, output=output)


def decoder_forward(z, params, *, block_rows=1024, out_dtype=jnp.float32):
    """z: [B, latent]; params from prepare_decoder_params -> [B, output]."""
    B, latent = z.shape
    assert latent == params["latent"]
    HP = params["w1"].shape[1]
    output = params["output"]

    # Balanced row tiling:
    #   * >= 2 tiles when B allows so the "parallel" batch axis can be
    #     sharded across v7x's two TensorCores,
    #   * TM ~= ceil(B / n_tiles) rounded to the 8-row sublane granule so the
    #     last tile wastes < 8 rows instead of up to TM-1.
    min_tiles = 2 if B >= 16 else 1
    n_tiles = max(pl.cdiv(B, block_rows), min_tiles)
    TM = _round_up(pl.cdiv(B, n_tiles), 8)
    nb = pl.cdiv(B, TM)
    Bp = nb * TM

    z_p = z.astype(jnp.bfloat16)
    if Bp != B:
        z_p = jnp.zeros((Bp, latent), jnp.bfloat16).at[:B].set(z_p)

    out_p = pl.pallas_call(
        decoder_kernel,
        out_shape=jax.ShapeDtypeStruct((Bp, output), out_dtype),
        grid=(nb,),
        in_specs=[
            pl.BlockSpec((TM, latent), lambda i: (i, 0)),   # z row tile
            pl.BlockSpec((latent, HP), lambda i: (0, 0)),   # w1 (resident)
            pl.BlockSpec((1, HP), lambda i: (0, 0)),        # b1 (resident)
            pl.BlockSpec((HP, output), lambda i: (0, 0)),   # w2 (resident)
            pl.BlockSpec((1, output), lambda i: (0, 0)),    # b2 (resident)
        ],
        # Un-padded output block (full-array-dim exception on the last axis):
        # halves writeback bytes vs. the old 128-lane padded f32 tile.
        out_specs=pl.BlockSpec((TM, output), lambda i: (i, 0)),
        compiler_params=pltpu.CompilerParams(
            dimension_semantics=("parallel",),
        ),
    )(z_p, params["w1"], params["b1"], params["w2"], params["b2"])

    # Row-only slice (no column slice needed); no slice at all if un-padded.
    return out_p if Bp == B else out_p[:B]


def init_linear(key, in_dim, out_dim):
    """Deterministic init mirroring nn.Linear's uniform(-1/sqrt(in), 1/sqrt(in)).
    Weight stored as [in_dim, out_dim] (transposed vs PyTorch), bias [out_dim]."""
    k_w, k_b = jax.random.split(key)
    bound = 1.0 / jnp.sqrt(in_dim)
    w = jax.random.uniform(k_w, (in_dim, out_dim), jnp.float32, -bound, bound)
    b = jax.random.uniform(k_b, (out_dim,), jnp.float32, -bound, bound)
    return w, b


if __name__ == "__main__":
    # Small shapes consistent with the module: latent=16, hidden=32, output=64.
    B, latent_dim, hidden_dim, output_dim = 8, 16, 32, 64

    key = jax.random.PRNGKey(0)
    k_z, k_fc1, k_fc2 = jax.random.split(key, 3)

    z = jax.random.normal(k_z, (B, latent_dim), jnp.float32)
    w1, b1 = init_linear(k_fc1, latent_dim, hidden_dim)
    w2, b2 = init_linear(k_fc2, hidden_dim, output_dim)

    # One-time param prep (hoisted out of the per-call path).
    params = prepare_decoder_params(w1, b1, w2, b2)
    params = jax.tree_util.tree_map(
        lambda x: jax.block_until_ready(x) if isinstance(x, jax.Array) else x,
        params)

    x_hat = decoder_forward(z, params)
    jax.block_until_ready(x_hat)

    # Pure-JAX f32 reference; bf16 matmul inputs => loosened tolerance.
    h_ref = jnp.maximum(z @ w1 + b1[None, :], 0.0)
    ref = jax.nn.sigmoid(h_ref @ w2 + b2[None, :])
    assert x_hat.shape == (B, output_dim)
    assert jnp.allclose(x_hat, ref, atol=2e-2), "mismatch vs reference"

    print("KERNEL_OK")
</pallas_src>

<mosaic_0001>
module attributes {stable_mosaic.version = 11 : i64} {
  func.func @decoder_kernel(%arg0: i32, %arg1: memref<8x16xbf16, #tpu.memory_space<vmem>>, %arg2: memref<16x128xbf16, #tpu.memory_space<vmem>>, %arg3: memref<1x128xf32, #tpu.memory_space<vmem>>, %arg4: memref<128x64xbf16, #tpu.memory_space<vmem>>, %arg5: memref<1x64xf32, #tpu.memory_space<vmem>>, %arg6: memref<8x64xf32, #tpu.memory_space<vmem>>) attributes {dimension_semantics = [#tpu.dimension_semantics<parallel>], iteration_bounds = array<i64: 1>, scalar_prefetch = 0 : i64, scratch_operands = 0 : i64, tpu.core_type = #tpu.core_type<tc>, window_params = [{transform_indices = @transform_0, window_bounds = array<i64: 8, 16>}, {pipeline_mode = #tpu.pipeline_mode<synchronous>, transform_indices = @transform_1, window_bounds = array<i64: 16, 128>}, {pipeline_mode = #tpu.pipeline_mode<synchronous>, transform_indices = @transform_2, window_bounds = array<i64: 1, 128>}, {pipeline_mode = #tpu.pipeline_mode<synchronous>, transform_indices = @transform_3, window_bounds = array<i64: 128, 64>}, {pipeline_mode = #tpu.pipeline_mode<synchronous>, transform_indices = @transform_4, window_bounds = array<i64: 1, 64>}, {transform_indices = @transform_5, window_bounds = array<i64: 8, 64>}]} {
    %c0 = arith.constant 0 : index
    %c0_0 = arith.constant 0 : index
    %0 = vector.load %arg1[%c0, %c0_0] : memref<8x16xbf16, #tpu.memory_space<vmem>>, vector<8x16xbf16>
    %c0_1 = arith.constant 0 : index
    %c0_2 = arith.constant 0 : index
    %1 = vector.load %arg2[%c0_1, %c0_2] : memref<16x128xbf16, #tpu.memory_space<vmem>>, vector<16x128xbf16>
    %cst = arith.constant dense<0.000000e+00> : vector<8x128xf32>
    %2 = tpu.matmul %0, %1, %cst {dimension_numbers = #tpu.dot_dimension_numbers<[1], [0], [0], [1], [0, 0, 1, 1], [], []>} : vector<8x16xbf16>, vector<16x128xbf16>, vector<8x128xf32> -> vector<8x128xf32>
    %c0_3 = arith.constant 0 : index
    %c0_4 = arith.constant 0 : index
    %3 = vector.load %arg3[%c0_3, %c0_4] : memref<1x128xf32, #tpu.memory_space<vmem>>, vector<1x128xf32>
    %4 = vector.broadcast %3 : vector<1x128xf32> to vector<8x128xf32>
    %5 = arith.addf %2, %4 : vector<8x128xf32>
    %cst_5 = arith.constant 0.000000e+00 : f32
    %6 = vector.broadcast %cst_5 : f32 to vector<8x128xf32>
    %7 = arith.maximumf %5, %6 : vector<8x128xf32>
    %8 = arith.truncf %7 : vector<8x128xf32> to vector<8x128xbf16>
    %c0_6 = arith.constant 0 : index
    %c0_7 = arith.constant 0 : index
    %9 = vector.load %arg4[%c0_6, %c0_7] : memref<128x64xbf16, #tpu.memory_space<vmem>>, vector<128x64xbf16>
    %cst_8 = arith.constant dense<0.000000e+00> : vector<8x64xf32>
    %10 = tpu.matmul %8, %9, %cst_8 {dimension_numbers = #tpu.dot_dimension_numbers<[1], [0], [0], [1], [0, 0, 1, 1], [], []>} : vector<8x128xbf16>, vector<128x64xbf16>, vector<8x64xf32> -> vector<8x64xf32>
    %c0_9 = arith.constant 0 : index
    %c0_10 = arith.constant 0 : index
    %11 = vector.load %arg5[%c0_9, %c0_10] : memref<1x64xf32, #tpu.memory_space<vmem>>, vector<1x64xf32>
    %12 = vector.broadcast %11 : vector<1x64xf32> to vector<8x64xf32>
    %13 = arith.addf %10, %12 : vector<8x64xf32>
    %14 = arith.negf %13 : vector<8x64xf32>
    %15 = math.exp %14 : vector<8x64xf32>
    %cst_11 = arith.constant 1.000000e+00 : f32
    %16 = vector.broadcast %cst_11 : f32 to vector<8x64xf32>
    %17 = arith.addf %16, %15 : vector<8x64xf32>
    %18 = arith.divf %16, %17 : vector<8x64xf32>
    %c0_12 = arith.constant 0 : index
    %c0_13 = arith.constant 0 : index
    %19 = vector.load %arg6[%c0_12, %c0_13] : memref<8x64xf32, #tpu.memory_space<vmem>>, vector<8x64xf32>
    tpu.vector_store %arg6[%c0_12, %c0_13], %18 {strides = array<i32>} : memref<8x64xf32, #tpu.memory_space<vmem>>, vector<8x64xf32>,
    return
  }
  func.func @transform_0(%arg0: i32) -> (i32, i32) {
    %c0_i32 = arith.constant 0 : i32
    %c0_i32_0 = arith.constant 0 : i32
    return %arg0, %c0_i32 : i32, i32
  }
  func.func @transform_1(%arg0: i32) -> (i32, i32) {
    %c0_i32 = arith.constant 0 : i32
    %c0_i32_0 = arith.constant 0 : i32
    %c0_i32_1 = arith.constant 0 : i32
    return %c0_i32, %c0_i32_0 : i32, i32
  }
  func.func @transform_2(%arg0: i32) -> (i32, i32) {
    %c0_i32 = arith.constant 0 : i32
    %c0_i32_0 = arith.constant 0 : i32
    %c0_i32_1 = arith.constant 0 : i32
    return %c0_i32, %c0_i32_0 : i32, i32
  }
  func.func @transform_3(%arg0: i32) -> (i32, i32) {
    %c0_i32 = arith.constant 0 : i32
    %c0_i32_0 = arith.constant 0 : i32
    %c0_i32_1 = arith.constant 0 : i32
    return %c0_i32, %c0_i32_0 : i32, i32
  }
  func.func @transform_4(%arg0: i32) -> (i32, i32) {
    %c0_i32 = arith.constant 0 : i32
    %c0_i32_0 = arith.constant 0 : i32
    %c0_i32_1 = arith.constant 0 : i32
    return %c0_i32, %c0_i32_0 : i32, i32
  }
  func.func @transform_5(%arg0: i32) -> (i32, i32) {
    %c0_i32 = arith.constant 0 : i32
    %c0_i32_0 = arith.constant 0 : i32
    return %arg0, %c0_i32 : i32, i32
  }
}

</mosaic_0001>

<bundles_post_ra>
// kernel: tpu_custom_call.1
= control target key start
LH: loop header
LB: loop body
LE: loop exit
PB: predicated region body
PF: predicated region fallthrough
CT: control target
= control target key end

     0   :  { %v307_v1 = vmov 0.0   ;;  %vm308_vm0 = vmmov 0   ;;  %vm38_vm1 = vcmask 130048   ;;  %s388_s0 = inlined_call_operand.vmem [shape: bf16[8,16], index: 0, kind: input, shape index: {}]   ;;  %s389_s1 = inlined_call_operand.vmem [shape: bf16[16,128], index: 1, kind: input, shape index: {}]   ;;  %s390_s2 = inlined_call_operand.vmem [shape: f32[1,128], index: 2, kind: input, shape index: {}]   ;;  %s391_s3 = inlined_call_operand.vmem [shape: bf16[128,64], index: 3, kind: input, shape index: {}]   ;;  %s392_s4 = inlined_call_operand.vmem [shape: f32[1,64], index: 4, kind: input, shape index: {}]   ;;  %s393_s5 = inlined_call_operand.hbm [shape: f32[8,64], index: 5, kind: output, shape index: {}]  }
   0x1   :  { %v270_v0 = vld [vmem:[%s389_s1] sm:$0xff]   ;;  %241 = vmatprep.subr.bf16.mxu0 %v307_v1  ;;  %247 = vmatprep.subr.bf16.mxu1 %v307_v1  ;;  %v272_v4 = vld [vmem:[%s391_s3 + $0x8] sm:$0xff]   ;;  %v273_v5 = vld [vmem:[%s391_s3 + $0x10] sm:$0xff]  }
   0x2   :  { %v22_v2 = vld [vmem:[%s388_s0] sm:$0xf]  ;;  %242 = vmatpush3.bf16.msra.mxu0 %v270_v0  ;;  %243 = vmatprep.mubr.msk.bf16.mxu0 %vm308_vm0, %v307_v1 }
   0x3   :  { %v271_v3 = vld [vmem:[%s391_s3] sm:$0xff]   ;;  %263 = vmatprep.mubr.msk.bf16.mxu1 %vm308_vm0, %v307_v1 }
   0x4   :  { %248 = vmatpush3.bf16.msra.mxu1 %v271_v3 }
   0x5   :  { %244 = vmatmul.mubr.msk.bf16.vlgmr.msra.gmra.mrb[0].mxu0 %vm38_vm1, %v22_v2  ;;  %249 = vmatprep.subr.bf16.mxu1 %v307_v1 }
   0x8   :  { %250 = vmatpush3.bf16.msra.mxu1 %v272_v4 }
   0x9   :  { %251 = vmatprep.subr.bf16.mxu1 %v307_v1 }
   0xa   :  { %10 = vsyncpa [#allocation3], 0  ;;  %v274_v6 = vld [vmem:[%s391_s3 + $0x18] sm:$0xff]   ;;  %v275_v7 = vld [vmem:[%s391_s3 + $0x20] sm:$0xff]   ;;  %vm201_vm2 = vcmask 523264  }
   0xb   :  { %v276_v8 = vld [vmem:[%s391_s3 + $0x28] sm:$0xff]   ;;  %v277_v9 = vld [vmem:[%s391_s3 + $0x30] sm:$0xff]   ;;  %v278_v10 = vld [vmem:[%s391_s3 + $0x38] sm:$0xff]  }
   0xc   :  { %252 = vmatpush3.bf16.msra.mxu1 %v273_v5  ;;  %v217_v11 = vld [vmem:[%s390_s2] ss:$0 sm:$0xff]  ;;  %s309_s2 = smov [#allocation2]  }
   0xd   :  { %253 = vmatprep.subr.bf16.mxu1 %v307_v1  ;;  %v220_v19 = vld [vmem:[%s392_s4] ss:$0 sm:$0xff]  ;;  %s209_s3 = sshll.u32 %s309_s2, 4  ;;  %s210_s3 = int_to_ptr.vmem [resolvable:$true] %s209_s3 }
   0xe   :  { %s283_s15 = scalar_lea.vmem %s210_s3, 128  ;;  %p288_p1 = scmp.lt.s32.totalorder %s210_s3, %s210_s3 }
   0xf   :  { %p284_p0 = scmp.ne.s32.totalorder %s210_s3, %s283_s15  ;;  %p289_p2 = scmp.lt.s32.totalorder %s283_s15, %s283_s15 }
  0x10   :  { %254 = vmatpush3.bf16.msra.mxu1 %v274_v6 }
  0x11   :  { %255 = vmatprep.subr.bf16.mxu1 %v307_v1  ;;  %p290_p3 = por %p289_p2, %p288_p1 }
  0x13   :  { %p291_p4 = pnand %p290_p3, %p284_p0 }
  0x14   :  { %256 = vmatpush3.bf16.msra.mxu1 %v275_v7 }
  0x15   :  { %257 = vmatprep.subr.bf16.mxu1 %v307_v1 }
  0x18   :  { %258 = vmatpush3.bf16.msra.mxu1 %v276_v8 }
  0x19   :  { %259 = vmatprep.subr.bf16.mxu1 %v307_v1 }
  0x1c   :  { %260 = vmatpush3.bf16.msra.mxu1 %v277_v9 }
  0x1d   :  { %261 = vmatprep.subr.bf16.mxu1 %v307_v1 }
  0x20   :  { %262 = vmatpush3.bf16.msra.mxu1 %v278_v10 }
  0xd8   :  { %v76_v12 = vpop.f32.mrb[0].mxu0 }
  0xd9   :  { %v77_v13 = vadd.f32 %v217_v11, %v76_v12  ;;  %v245_v14 = vpop.f32.mrb[1].mxu0 }
  0xda   :  { %v79_v15 = vpop.f32.mrb[2].mxu0 }
  0xdb   :  { %v82_v16 = vmax.f32 %v77_v13, 0.0  ;;  %v246_v17 = vpop.f32.mrb[3].mxu0 }
  0xdd   :  { %v83_v18 = vpack.c.bf16 %v82_v16, %v82_v16 }
  0xdf   :  { %264 = vmatmul.mubr.bf16.vlgmr.msra.gmra.mrb[0].mxu1 %v83_v18 }
 0x1b2   :  { %v189_v20 = vpop.f32.mrb[0].mxu1 }
 0x1b3   :  { %v190_v21 = vadd.f32 %v220_v19, %v189_v20  ;;  %v265_v22 = vpop.f32.mrb[1].mxu1 }
 0x1b4   :  { %v192_v23 = vpop.f32.mrb[2].mxu1 }
 0x1b5   :  { %v229_v24 = vmul.f32 -1.442695, %v190_v21  ;;  %v266_v25 = vpop.f32.mrb[3].mxu1 }
 0x1b7   :  { %279 = vpow2.f32 %v229_v24 }
 0x1c1   :  { %v280_v26 = vpop.eup %279 }
 0x1c2   :  { %v198_v27 = vadd.f32 1.0, %v280_v26 }
 0x1c4   :  { %281 = vrcp.f32 %v198_v27 }
 0x1ce   :  { %v282_v28 = vpop.eup %281 }
 0x1cf   :  { %202 = vst.msk [vmem:[#allocation2] sm:$0xff] %vm201_vm2, %v282_v28 }
 0x1d0   :  { %294 = shalt.err (!%p291_p4)
}
 0x1d1   :  { %s295_s17 = scalar_lea.hbm %s393_s5, 128 }
 0x1d2   :  { %p296_p5 = scmp.ne.s32.totalorder %s393_s5, %s295_s17  ;;  %p299_p6 = scmp.lt.u32.totalorder %s295_s17, %s393_s5 }
 0x1d4   :  { %p301_p7 = pnand %p299_p6, %p296_p5 }
 0x1d6   :  { %304 = shalt.err (!%p301_p7)
}
 0x1d7   :  { %212 = dma.vmem_to_hbm [thread:$0]  %s210_s3, 128, %s393_s5, [#allocation3]  }
 0x1d8   :  { %305 = dma.done.wait [#allocation3], 128  }
 0x1d9   :  { %306 = vsyncadd [#allocation3], 4294967168 }
 0x1da   :  { %216 = vsyncpa [#allocation3], 1 }

</bundles_post_ra>
